<compile_context>
chip_gen: v6e
topology: v6e:2x2x1
jax: 0.10.0
libtpu: 0.0.40
codegen_flags: <defaults>
</compile_context>

<pallas_src>
import functools

import jax
import jax.numpy as jnp
from jax.experimental import pallas as pl
from jax.experimental.pallas import tpu as pltpu

_LANE = 128


def _round_up(v, m):
    return (v + m - 1) // m * m


def _pad2(x, rows, cols):
    return jnp.pad(x, ((0, rows - x.shape[0]), (0, cols - x.shape[1])))


# ---------------------------------------------------------------------------
# Fused kernel: conv1 + relu + conv2 + relu + linear + log_softmax
# (single block: all padded operands fit comfortably in VMEM at these sizes)
# ---------------------------------------------------------------------------
def _fused_gcn_kernel(num_classes, agg_first_conv1,
                      a_ref, x_ref, w1_ref, b1_ref, w2_ref, b2_ref,
                      wl_ref, bl_ref, o_ref):
    a = a_ref[...]  # bf16 (Np, Np); loaded from VMEM once, reused by both convs

    # ---- conv1: relu(aggregate/transform in the cheaper order + b1) -------
    if agg_first_conv1:            # F_in <= H: (A @ X) @ W1
        h = jnp.dot(a, x_ref[...], preferred_element_type=jnp.float32)
        h = jnp.dot(h.astype(jnp.bfloat16), w1_ref[...],
                    preferred_element_type=jnp.float32)
    else:                          # F_in >  H: A @ (X @ W1)
        h = jnp.dot(x_ref[...], w1_ref[...], preferred_element_type=jnp.float32)
        h = jnp.dot(a, h.astype(jnp.bfloat16), preferred_element_type=jnp.float32)
    h = jnp.maximum(h + b1_ref[...], 0.0)
    # dropout -> identity (inference mode)

    # ---- conv2: relu(A_hat @ (H @ W2) + b2) -------------------------------
    h2 = jnp.dot(h.astype(jnp.bfloat16), w2_ref[...],
                 preferred_element_type=jnp.float32)
    h2 = jnp.dot(a, h2.astype(jnp.bfloat16), preferred_element_type=jnp.float32)
    h2 = jnp.maximum(h2 + b2_ref[...], 0.0)
    # dropout -> identity (inference mode)

    # ---- linear + log_softmax over the un-padded class columns ------------
    z = jnp.dot(h2.astype(jnp.bfloat16), wl_ref[...],
                preferred_element_type=jnp.float32) + bl_ref[...]
    col = jax.lax.broadcasted_iota(jnp.int32, z.shape, 1)
    valid = col < num_classes
    m = jnp.max(jnp.where(valid, z, -jnp.inf), axis=-1, keepdims=True)
    s = jnp.sum(jnp.where(valid, jnp.exp(z - m), 0.0), axis=-1, keepdims=True)
    o_ref[...] = z - (m + jnp.log(s))


# ---------------------------------------------------------------------------
# One-time (outside-jit) preparation of the static graph + weights
# ---------------------------------------------------------------------------
def prepare_static_operands(a_hat, params):
    """Pad to lane multiples and cast MXU operands to bf16 ONCE (static graph)."""
    n = a_hat.shape[0]
    f_in, h_dim = params["w1"].shape
    c = params["w_lin"].shape[1]

    n_p = _round_up(n, _LANE)
    f_p = _round_up(f_in, _LANE)
    h_p = _round_up(h_dim, _LANE)
    c_p = _round_up(c, _LANE)

    static = {
        "a": _pad2(a_hat, n_p, n_p).astype(jnp.bfloat16),
        "w1": _pad2(params["w1"], f_p, h_p).astype(jnp.bfloat16),
        "w2": _pad2(params["w2"], h_p, h_p).astype(jnp.bfloat16),
        "w_lin": _pad2(params["w_lin"], h_p, c_p).astype(jnp.bfloat16),
        "b1": jnp.pad(params["b1"], (0, h_p - h_dim)).reshape(1, h_p).astype(jnp.float32),
        "b2": jnp.pad(params["b2"], (0, h_p - h_dim)).reshape(1, h_p).astype(jnp.float32),
        "b_lin": jnp.pad(params["b_lin"], (0, c_p - c)).reshape(1, c_p).astype(jnp.float32),
    }
    dims = dict(n=n, f_in=f_in, h=h_dim, c=c, n_p=n_p, f_p=f_p, h_p=h_p, c_p=c_p)
    return static, dims


# ---------------------------------------------------------------------------
# Jittable forward (only x is padded per call; everything else pre-padded)
# ---------------------------------------------------------------------------
def gcn_lin_forward(x, edge_index, static, *, dims):
    n, f_in, h_dim, c = dims["n"], dims["f_in"], dims["h"], dims["c"]
    n_p, f_p, h_p, c_p = dims["n_p"], dims["f_p"], dims["h_p"], dims["c_p"]

    x_p = _pad2(x, n_p, f_p).astype(jnp.bfloat16)

    # Cheaper association for conv1 picked from TRUE dims (static Python bool).
    agg_first = f_in <= h_dim

    # ---- cost estimate: padded shapes = work actually executed ------------
    if agg_first:
        conv1_flops = 2 * n_p * n_p * f_p + 2 * n_p * f_p * h_p
    else:
        conv1_flops = 2 * n_p * f_p * h_p + 2 * n_p * n_p * h_p
    flops = (conv1_flops
             + 2 * n_p * h_p * h_p + 2 * n_p * n_p * h_p   # conv2
             + 2 * n_p * h_p * c_p)                        # linear
    bf16_in = 2 * (n_p * n_p + n_p * f_p + f_p * h_p + h_p * h_p + h_p * c_p)
    f32_in = 4 * (2 * h_p + c_p)
    out_bytes = 4 * n_p * c_p
    bytes_accessed = bf16_in + f32_in + out_bytes

    # ---- VMEM budget: operands + f32 intermediates + 25% headroom ---------
    f32_temps = 4 * 3 * n_p * max(f_p, h_p, c_p)            # h, h2, z
    vmem_needed = bf16_in + f32_in + out_bytes + f32_temps
    vmem_limit = int(min(max(int(vmem_needed * 1.25), 32 << 20), 64 << 20))

    vmem = pl.BlockSpec(memory_space=pltpu.MemorySpace.VMEM)
    out_p = pl.pallas_call(
        functools.partial(_fused_gcn_kernel, c, agg_first),
        out_shape=jax.ShapeDtypeStruct((n_p, c_p), jnp.float32),
        in_specs=[vmem] * 8,
        out_specs=vmem,
        compiler_params=pltpu.CompilerParams(vmem_limit_bytes=vmem_limit),
        cost_estimate=pl.CostEstimate(
            flops=int(flops),
            transcendentals=int(n_p * c_p + n_p),
            bytes_accessed=int(bytes_accessed)),
    )(static["a"], x_p, static["w1"], static["b1"],
      static["w2"], static["b2"], static["w_lin"], static["b_lin"])

    return out_p[:n, :c], edge_index


def normalized_adjacency(edge_index, num_nodes):
    """Dense GCN normalization D^{-1/2}(A + I)D^{-1/2} (plain-JAX glue).

    Built ONCE for a static graph; padded/cast once by prepare_static_operands.
    """
    src = edge_index[0]
    dst = edge_index[1]
    loops = jnp.arange(num_nodes, dtype=edge_index.dtype)
    src = jnp.concatenate([src, loops])
    dst = jnp.concatenate([dst, loops])
    a = jnp.zeros((num_nodes, num_nodes), jnp.float32).at[dst, src].add(1.0)
    deg = a.sum(axis=1)
    dinv = jnp.where(deg > 0, 1.0 / jnp.sqrt(deg), 0.0)
    return dinv[:, None] * a * dinv[None, :]


def gcn_lin_reference(x, a_hat, params):
    """Pure-JAX f32 reference for tolerance checking."""
    h = jnp.maximum(a_hat @ (x @ params["w1"]) + params["b1"], 0.0)
    h2 = jnp.maximum(a_hat @ (h @ params["w2"]) + params["b2"], 0.0)
    z = h2 @ params["w_lin"] + params["b_lin"]
    return jax.nn.log_softmax(z, axis=-1)


# ---------------------------------------------------------------------------
# Main
# ---------------------------------------------------------------------------
if __name__ == "__main__":
    N = 16            # nodes
    F_IN = 8          # num_features
    H = 32            # hidden_units
    C = 4             # num_classes
    E = 40            # edges

    key = jax.random.PRNGKey(0)
    k_x, k_e, k_w1, k_w2, k_wl = jax.random.split(key, 5)

    x = jax.random.normal(k_x, (N, F_IN), jnp.float32)
    edge_index = jax.random.randint(k_e, (2, E), 0, N, jnp.int32)

    params = {
        "w1": jax.random.normal(k_w1, (F_IN, H), jnp.float32) * (1.0 / jnp.sqrt(F_IN)),
        "b1": jnp.zeros((H,), jnp.float32),
        "w2": jax.random.normal(k_w2, (H, H), jnp.float32) * (1.0 / jnp.sqrt(H)),
        "b2": jnp.zeros((H,), jnp.float32),
        "w_lin": jax.random.normal(k_wl, (H, C), jnp.float32) * (1.0 / jnp.sqrt(H)),
        "b_lin": jnp.zeros((C,), jnp.float32),
    }

    # Static graph: build A_hat once, pad + bf16-cast weights/adjacency ONCE,
    # outside the jitted per-call path.
    a_hat = normalized_adjacency(edge_index, N)
    static, dims = prepare_static_operands(a_hat, params)

    forward = jax.jit(functools.partial(gcn_lin_forward, dims=dims))
    out, ei = forward(x, edge_index, static)
    jax.block_until_ready(out)

    assert out.shape == (N, C)
    # rows of log_softmax must sum to ~1 after exp
    assert bool(jnp.all(jnp.abs(jnp.exp(out).sum(axis=-1) - 1.0) < 1e-3))
    # tolerance check against the f32 pure-JAX reference (bf16 MXU operands)
    ref = gcn_lin_reference(x, a_hat, params)
    assert bool(jnp.max(jnp.abs(out - ref)) < 1e-1), float(jnp.max(jnp.abs(out - ref)))
    print("KERNEL_OK")
</pallas_src>

<mosaic_0001>
module attributes {stable_mosaic.version = 11 : i64} {
  func.func @_fused_gcn_kernel(%arg0: memref<128x128xbf16, #tpu.memory_space<vmem>>, %arg1: memref<128x128xbf16, #tpu.memory_space<vmem>>, %arg2: memref<128x128xbf16, #tpu.memory_space<vmem>>, %arg3: memref<1x128xf32, #tpu.memory_space<vmem>>, %arg4: memref<128x128xbf16, #tpu.memory_space<vmem>>, %arg5: memref<1x128xf32, #tpu.memory_space<vmem>>, %arg6: memref<128x128xbf16, #tpu.memory_space<vmem>>, %arg7: memref<1x128xf32, #tpu.memory_space<vmem>>, %arg8: memref<128x128xf32, #tpu.memory_space<vmem>>) attributes {dimension_semantics = [], scalar_prefetch = 0 : i64, scratch_operands = 0 : i64, tpu.core_type = #tpu.core_type<tc>} {
    %c0 = arith.constant 0 : index
    %c0_0 = arith.constant 0 : index
    %0 = vector.load %arg0[%c0, %c0_0] : memref<128x128xbf16, #tpu.memory_space<vmem>>, vector<128x128xbf16>
    %c0_1 = arith.constant 0 : index
    %c0_2 = arith.constant 0 : index
    %1 = vector.load %arg1[%c0_1, %c0_2] : memref<128x128xbf16, #tpu.memory_space<vmem>>, vector<128x128xbf16>
    %cst = arith.constant dense<0.000000e+00> : vector<128x128xf32>
    %2 = tpu.matmul %0, %1, %cst {dimension_numbers = #tpu.dot_dimension_numbers<[1], [0], [0], [1], [0, 0, 1, 1], [], []>} : vector<128x128xbf16>, vector<128x128xbf16>, vector<128x128xf32> -> vector<128x128xf32>
    %3 = arith.truncf %2 : vector<128x128xf32> to vector<128x128xbf16>
    %c0_3 = arith.constant 0 : index
    %c0_4 = arith.constant 0 : index
    %4 = vector.load %arg2[%c0_3, %c0_4] : memref<128x128xbf16, #tpu.memory_space<vmem>>, vector<128x128xbf16>
    %cst_5 = arith.constant dense<0.000000e+00> : vector<128x128xf32>
    %5 = tpu.matmul %3, %4, %cst_5 {dimension_numbers = #tpu.dot_dimension_numbers<[1], [0], [0], [1], [0, 0, 1, 1], [], []>} : vector<128x128xbf16>, vector<128x128xbf16>, vector<128x128xf32> -> vector<128x128xf32>
    %c0_6 = arith.constant 0 : index
    %c0_7 = arith.constant 0 : index
    %6 = vector.load %arg3[%c0_6, %c0_7] : memref<1x128xf32, #tpu.memory_space<vmem>>, vector<1x128xf32>
    %7 = vector.broadcast %6 : vector<1x128xf32> to vector<128x128xf32>
    %8 = arith.addf %5, %7 : vector<128x128xf32>
    %cst_8 = arith.constant 0.000000e+00 : f32
    %9 = vector.broadcast %cst_8 : f32 to vector<128x128xf32>
    %10 = arith.maximumf %8, %9 : vector<128x128xf32>
    %11 = arith.truncf %10 : vector<128x128xf32> to vector<128x128xbf16>
    %c0_9 = arith.constant 0 : index
    %c0_10 = arith.constant 0 : index
    %12 = vector.load %arg4[%c0_9, %c0_10] : memref<128x128xbf16, #tpu.memory_space<vmem>>, vector<128x128xbf16>
    %cst_11 = arith.constant dense<0.000000e+00> : vector<128x128xf32>
    %13 = tpu.matmul %11, %12, %cst_11 {dimension_numbers = #tpu.dot_dimension_numbers<[1], [0], [0], [1], [0, 0, 1, 1], [], []>} : vector<128x128xbf16>, vector<128x128xbf16>, vector<128x128xf32> -> vector<128x128xf32>
    %14 = arith.truncf %13 : vector<128x128xf32> to vector<128x128xbf16>
    %cst_12 = arith.constant dense<0.000000e+00> : vector<128x128xf32>
    %15 = tpu.matmul %0, %14, %cst_12 {dimension_numbers = #tpu.dot_dimension_numbers<[1], [0], [0], [1], [0, 0, 1, 1], [], []>} : vector<128x128xbf16>, vector<128x128xbf16>, vector<128x128xf32> -> vector<128x128xf32>
    %c0_13 = arith.constant 0 : index
    %c0_14 = arith.constant 0 : index
    %16 = vector.load %arg5[%c0_13, %c0_14] : memref<1x128xf32, #tpu.memory_space<vmem>>, vector<1x128xf32>
    %17 = vector.broadcast %16 : vector<1x128xf32> to vector<128x128xf32>
    %18 = arith.addf %15, %17 : vector<128x128xf32>
    %cst_15 = arith.constant 0.000000e+00 : f32
    %19 = vector.broadcast %cst_15 : f32 to vector<128x128xf32>
    %20 = arith.maximumf %18, %19 : vector<128x128xf32>
    %21 = arith.truncf %20 : vector<128x128xf32> to vector<128x128xbf16>
    %c0_16 = arith.constant 0 : index
    %c0_17 = arith.constant 0 : index
    %22 = vector.load %arg6[%c0_16, %c0_17] : memref<128x128xbf16, #tpu.memory_space<vmem>>, vector<128x128xbf16>
    %cst_18 = arith.constant dense<0.000000e+00> : vector<128x128xf32>
    %23 = tpu.matmul %21, %22, %cst_18 {dimension_numbers = #tpu.dot_dimension_numbers<[1], [0], [0], [1], [0, 0, 1, 1], [], []>} : vector<128x128xbf16>, vector<128x128xbf16>, vector<128x128xf32> -> vector<128x128xf32>
    %c0_19 = arith.constant 0 : index
    %c0_20 = arith.constant 0 : index
    %24 = vector.load %arg7[%c0_19, %c0_20] : memref<1x128xf32, #tpu.memory_space<vmem>>, vector<1x128xf32>
    %25 = vector.broadcast %24 : vector<1x128xf32> to vector<128x128xf32>
    %26 = arith.addf %23, %25 : vector<128x128xf32>
    %27 = tpu.iota {dimensions = array<i32: 1>} : vector<128x128xi32>
    %c4_i32 = arith.constant 4 : i32
    %28 = vector.broadcast %c4_i32 : i32 to vector<128x128xi32>
    %29 = arith.cmpi slt, %27, %28 : vector<128x128xi32>
    %cst_21 = arith.constant 0xFF800000 : f32
    %30 = vector.broadcast %cst_21 : f32 to vector<128x128xf32>
    %31 = arith.select %29, %26, %30 : vector<128x128xi1>, vector<128x128xf32>
    %cst_22 = arith.constant dense<0xFF800000> : vector<128xf32>
    %32 = vector.multi_reduction <maximumf>, %31, %cst_22 [1] : vector<128x128xf32> to vector<128xf32>
    %33 = vector.shape_cast %32 : vector<128xf32> to vector<128x1xf32>
    %34 = vector.broadcast %33 : vector<128x1xf32> to vector<128x128xf32>
    %35 = arith.subf %26, %34 : vector<128x128xf32>
    %36 = math.exp %35 : vector<128x128xf32>
    %cst_23 = arith.constant 0.000000e+00 : f32
    %37 = vector.broadcast %cst_23 : f32 to vector<128x128xf32>
    %38 = arith.select %29, %36, %37 : vector<128x128xi1>, vector<128x128xf32>
    %cst_24 = arith.constant dense<0.000000e+00> : vector<128xf32>
    %39 = vector.multi_reduction <add>, %38, %cst_24 [1] : vector<128x128xf32> to vector<128xf32>
    %40 = vector.shape_cast %39 : vector<128xf32> to vector<128x1xf32>
    %41 = math.log %40 : vector<128x1xf32>
    %42 = arith.addf %33, %41 : vector<128x1xf32>
    %43 = vector.broadcast %42 : vector<128x1xf32> to vector<128x128xf32>
    %44 = arith.subf %26, %43 : vector<128x128xf32>
    %c0_25 = arith.constant 0 : index
    %c0_26 = arith.constant 0 : index
    %45 = vector.load %arg8[%c0_25, %c0_26] : memref<128x128xf32, #tpu.memory_space<vmem>>, vector<128x128xf32>
    tpu.vector_store %arg8[%c0_25, %c0_26], %44 {strides = array<i32>} : memref<128x128xf32, #tpu.memory_space<vmem>>, vector<128x128xf32>,
    return
  }
}

</mosaic_0001>

<bundles_post_ra>
// kernel: gcn_lin_forward.1
= control target key start
LH: loop header
LB: loop body
LE: loop exit
PB: predicated region body
PF: predicated region fallthrough
CT: control target
= control target key end

     0   :  { %13 = vsyncpa [#allocation3], 0  ;;  %s2073_s0 = inlined_call_operand.vmem [shape: bf16[128,128], index: 0, kind: input, shape index: {}]   ;;  %s2074_s1 = inlined_call_operand.vmem [shape: bf16[128,128], index: 1, kind: input, shape index: {}]   ;;  %s2075_s2 = inlined_call_operand.hbm [shape: bf16[128,128], index: 2, kind: input, shape index: {}]   ;;  %s2076_s3 = inlined_call_operand.vmem [shape: f32[1,128], index: 3, kind: input, shape index: {}]   ;;  %s2077_s4 = inlined_call_operand.hbm [shape: bf16[128,128], index: 4, kind: input, shape index: {}]   ;;  %s2078_s5 = inlined_call_operand.vmem [shape: f32[1,128], index: 5, kind: input, shape index: {}]   ;;  %s2079_s6 = inlined_call_operand.hbm [shape: bf16[128,128], index: 6, kind: input, shape index: {}]   ;;  %s2080_s7 = inlined_call_operand.vmem [shape: f32[1,128], index: 7, kind: input, shape index: {}]   ;;  %s2081_s8 = inlined_call_operand.vmem [shape: f32[128,128], index: 8, kind: output, shape index: {}]  }
   0x1   :  { %14 = vsyncpa [#allocation5], 0  ;;  %s1666_s27 = smov [#allocation4]   ;;  %s1667_s29 = smov [#allocation2]  }
   0x2   :  { %s38_s28 = sshll.u32 %s1666_s27, 4  ;;  %s24_s30 = sshll.u32 %s1667_s29, 4  ;;  %s39_s28 = int_to_ptr.vmem [resolvable:$true] %s38_s28  ;;  %s25_s30 = int_to_ptr.vmem [resolvable:$true] %s24_s30 }
   0x3   :  { %s1610_s9 = scalar_lea.vmem %s39_s28, 1024  ;;  %p1615_p1 = scmp.lt.s32.totalorder %s39_s28, %s39_s28 }
   0x4   :  { %p1611_p0 = scmp.ne.s32.totalorder %s39_s28, %s1610_s9  ;;  %p1616_p2 = scmp.lt.s32.totalorder %s1610_s9, %s1610_s9 }
   0x6   :  { %p1617_p3 = por %p1616_p2, %p1615_p1 }
   0x8   :  { %p1618_p4 = pnand %p1617_p3, %p1611_p0 }
   0xa   :  { %1621 = shalt.err (!%p1618_p4)
}
   0xb   :  { %s1668_s10 = smov 64   ;;  %s1669_s11 = smov 4  }
   0xc   :  { %44 = dma.hbm_to_vmem [thread:$0]  %s2077_s4, 1024, %s39_s28, [#allocation5], %s1668_s10, %s1668_s10, %s1669_s11  }
   0xd   :  { %s1630_s14 = scalar_lea.vmem %s25_s30, 1024  ;;  %p1635_p6 = scmp.lt.s32.totalorder %s25_s30, %s25_s30 }
   0xe   :  { %p1631_p5 = scmp.ne.s32.totalorder %s25_s30, %s1630_s14  ;;  %p1636_p7 = scmp.lt.s32.totalorder %s1630_s14, %s1630_s14 }
  0x10   :  { %p1637_p8 = por %p1636_p7, %p1635_p6 }
  0x12   :  { %p1638_p9 = pnand %p1637_p8, %p1631_p5 }
  0x14   :  { %1641 = shalt.err (!%p1638_p9)
}
  0x15   :  { %30 = dma.hbm_to_vmem [thread:$0]  %s2075_s2, 1024, %s25_s30, [#allocation3], %s1668_s10, %s1668_s10, %s1669_s11  }
  0x16   :  { %s1670_s17 = smov [#allocation6]  }
  0x17   :  { %s52_s18 = sshll.u32 %s1670_s17, 4  ;;  %s53_s18 = int_to_ptr.vmem [resolvable:$true] %s52_s18 }
  0x18   :  { %s1650_s19 = scalar_lea.vmem %s53_s18, 1024  ;;  %p1655_p11 = scmp.lt.s32.totalorder %s53_s18, %s53_s18 }
  0x19   :  { %p1651_p10 = scmp.ne.s32.totalorder %s53_s18, %s1650_s19  ;;  %p1656_p12 = scmp.lt.s32.totalorder %s1650_s19, %s1650_s19 }
  0x1b   :  { %p1657_p13 = por %p1656_p12, %p1655_p11 }
  0x1d   :  { %p1658_p0 = pnand %p1657_p13, %p1651_p10 }
  0x1f   :  { %1661 = shalt.err (!%p1658_p0)
}
  0x20   :  { %58 = dma.hbm_to_vmem [thread:$0]  %s2079_s6, 1024, %s53_s18, [#allocation5], %s1668_s10, %s1668_s10, %s1669_s11  }
  0x21   :  { %1662 = dma.done.wait [#allocation3], 1024  }
  0x22   :  { %1663 = vsyncadd [#allocation3], 4294966272 }
  0x23   :  { %1664 = dma.done.wait [#allocation5], 2048  }
  0x24   :  { %1665 = vsyncadd [#allocation5], 4294965248  ;;  %v1498_v0 = vld [vmem:[%s2074_s1 + $0x38] sm:$0xff]   ;;  %v1499_v1 = vld [vmem:[%s2074_s1 + $0x30] sm:$0xff]  }
  0x25   :  { %1317 = vmatprep.subr.bf16.mxu0 %v1498_v0  ;;  %v1500_v2 = vld [vmem:[%s2074_s1 + $0x28] sm:$0xff]   ;;  %v1501_v3 = vld [vmem:[%s2074_s1 + $0x20] sm:$0xff]   ;;  %v1502_v5 = vld [vmem:[%s2074_s1 + $0x18] sm:$0xff]  }
  0x26   :  { %1318 = vmatpush3.bf16.msra.mxu0 %v1498_v0  ;;  %v1740_v4 = vld [vmem:[%s2073_s0] sm:$0xff]   ;;  %v1503_v6 = vld [vmem:[%s2074_s1 + $0x10] sm:$0xff]   ;;  %v1514_v7 = vld [vmem:[#allocation2 + $0x38] sm:$0xff]  }
  0x27   :  { %1319 = vmatprep.subr.bf16.mxu0 %v1499_v1  ;;  %1333 = vmatprep.mubr.bf16.mxu0 %v1740_v4  ;;  %v1515_v8 = vld [vmem:[#allocation2 + $0x30] sm:$0xff]   ;;  %v1504_v9 = vld [vmem:[%s2074_s1 + $0x8] sm:$0xff]   ;;  %v1505_v11 = vld [vmem:[%s2074_s1] sm:$0xff]  }
  0x28   :  { %1349 = vmatprep.subr.bf16.mxu1 %v1514_v7  ;;  %v1516_v10 = vld [vmem:[#allocation2 + $0x28] sm:$0xff]   ;;  %v1517_v12 = vld [vmem:[#allocation2 + $0x20] sm:$0xff]   ;;  %v1518_v13 = vld [vmem:[#allocation2 + $0x18] sm:$0xff]  }
  0x29   :  { %1350 = vmatpush3.bf16.msra.mxu1 %v1514_v7  ;;  %v1758_v14 = vld [vmem:[%s2073_s0 + $0x8] sm:$0xff]   ;;  %v1763_v15 = vld [vmem:[%s2073_s0 + $0x10] sm:$0xff]   ;;  %v1770_v17 = vld [vmem:[%s2073_s0 + $0x18] sm:$0xff]  }
  0x2a   :  { %1320 = vmatpush3.bf16.msra.mxu0 %v1499_v1  ;;  %1351 = vmatprep.subr.bf16.mxu1 %v1515_v8  ;;  %v1519_v16 = vld [vmem:[#allocation2 + $0x10] sm:$0xff]   ;;  %v1775_v18 = vld [vmem:[%s2073_s0 + $0x20] sm:$0xff]   ;;  %v1782_v19 = vld [vmem:[%s2073_s0 + $0x28] sm:$0xff]  }
  0x2b   :  { %1321 = vmatprep.subr.bf16.mxu0 %v1500_v2  ;;  %v1787_v20 = vld [vmem:[%s2073_s0 + $0x30] sm:$0xff]   ;;  %v1794_v21 = vld [vmem:[%s2073_s0 + $0x38] sm:$0xff]   ;;  %v1520_v22 = vld [vmem:[#allocation2 + $0x8] sm:$0xff]  }
  0x2c   :  { %v1521_v23 = vld [vmem:[#allocation2] sm:$0xff]   ;;  %v1522_v24 = vld [vmem:[#allocation4 + $0x38] sm:$0xff]   ;;  %v1523_v25 = vld [vmem:[#allocation4 + $0x30] sm:$0xff]  }
  0x2d   :  { %1352 = vmatpush3.bf16.msra.mxu1 %v1515_v8  ;;  %v1524_v26 = vld [vmem:[#allocation4 + $0x28] sm:$0xff]   ;;  %v1525_v27 = vld [vmem:[#allocation4 + $0x20] sm:$0xff]   ;;  %v1526_v28 = vld [vmem:[#allocation4 + $0x18] sm:$0xff]  }
  0x2e   :  { %1322 = vmatpush3.bf16.msra.mxu0 %v1500_v2  ;;  %1353 = vmatprep.subr.bf16.mxu1 %v1516_v10  ;;  %v1527_v53 = vld [vmem:[#allocation4 + $0x10] sm:$0xff]   ;;  %v1528_v54 = vld [vmem:[#allocation4 + $0x8] sm:$0xff]   ;;  %v1529_v55 = vld [vmem:[#allocation4] sm:$0xff]  }
  0x2f   :  { %1323 = vmatprep.subr.bf16.mxu0 %v1501_v3  ;;  %v1210_v58 = vld [vmem:[%s2076_s3] ss:$0 sm:$0xff] }
  0x31   :  { %1354 = vmatpush3.bf16.msra.mxu1 %v1516_v10 }
  0x32   :  { %1324 = vmatpush3.bf16.msra.mxu0 %v1501_v3  ;;  %1355 = vmatprep.subr.bf16.mxu1 %v1517_v12 }
  0x33   :  { %1325 = vmatprep.subr.bf16.mxu0 %v1502_v5 }
  0x35   :  { %1356 = vmatpush3.bf16.msra.mxu1 %v1517_v12 }
  0x36   :  { %1326 = vmatpush3.bf16.msra.mxu0 %v1502_v5  ;;  %1357 = vmatprep.subr.bf16.mxu1 %v1518_v13 }
  0x37   :  { %1327 = vmatprep.subr.bf16.mxu0 %v1503_v6 }
  0x39   :  { %1358 = vmatpush3.bf16.msra.mxu1 %v1518_v13 }
  0x3a   :  { %1328 = vmatpush3.bf16.msra.mxu0 %v1503_v6  ;;  %1359 = vmatprep.subr.bf16.mxu1 %v1519_v16 }
  0x3b   :  { %1329 = vmatprep.subr.bf16.mxu0 %v1504_v9 }
  0x3d   :  { %1360 = vmatpush3.bf16.msra.mxu1 %v1519_v16 }
  0x3e   :  { %1330 = vmatpush3.bf16.msra.mxu0 %v1504_v9  ;;  %1361 = vmatprep.subr.bf16.mxu1 %v1520_v22 }
  0x3f   :  { %1331 = vmatprep.subr.bf16.mxu0 %v1505_v11 }
  0x41   :  { %1362 = vmatpush3.bf16.msra.mxu1 %v1520_v22 }
  0x42   :  { %1332 = vmatpush3.bf16.msra.mxu0 %v1505_v11  ;;  %1363 = vmatprep.subr.bf16.mxu1 %v1521_v23 }
  0x43   :  { %1381 = vmatprep.subr.bf16.mxu0 %v1522_v24 }
  0x45   :  { %1334 = vmatmul.mubr.bf16.vlgmr.msra.gmra.mxu0 %v1758_v14  ;;  %1364 = vmatpush3.bf16.msra.mxu1 %v1521_v23 }
  0x46   :  { %1337 = vmatprep.mubr.bf16.mxu0 %v1763_v15  ;;  %1382 = vmatpush3.bf16.msra.mxu0 %v1522_v24 }
  0x47   :  { %1383 = vmatprep.subr.bf16.mxu0 %v1523_v25 }
  0x4a   :  { %1384 = vmatpush3.bf16.msra.mxu0 %v1523_v25 }
  0x4b   :  { %1385 = vmatprep.subr.bf16.mxu0 %v1524_v26 }
  0x4d   :  { %1338 = vmatmul.mubr.bf16.gmra.mxu0 %v1770_v17 }
  0x4e   :  { %1341 = vmatprep.mubr.bf16.mxu0 %v1775_v18  ;;  %1386 = vmatpush3.bf16.msra.mxu0 %v1524_v26 }
  0x4f   :  { %1387 = vmatprep.subr.bf16.mxu0 %v1525_v27 }
  0x52   :  { %1388 = vmatpush3.bf16.msra.mxu0 %v1525_v27 }
  0x53   :  { %1389 = vmatprep.subr.bf16.mxu0 %v1526_v28 }
  0x55   :  { %1342 = vmatmul.mubr.bf16.gmra.mxu0 %v1782_v19 }
  0x56   :  { %1345 = vmatprep.mubr.bf16.mxu0 %v1787_v20  ;;  %1390 = vmatpush3.bf16.msra.mxu0 %v1526_v28 }
  0x57   :  { %1391 = vmatprep.subr.bf16.mxu0 %v1527_v53 }
  0x5a   :  { %1392 = vmatpush3.bf16.msra.mxu0 %v1527_v53 }
  0x5b   :  { %1393 = vmatprep.subr.bf16.mxu0 %v1528_v54 }
  0x5d   :  { %1346 = vmatmul.mubr.bf16.gmra.mxu0 %v1794_v21 }
  0x5e   :  { %1394 = vmatpush3.bf16.msra.mxu0 %v1528_v54 }
  0x5f   :  { %1395 = vmatprep.subr.bf16.mxu0 %v1529_v55 }
  0x62   :  { %1396 = vmatpush3.bf16.msra.mxu0 %v1529_v55 }
 0x105   :  { %v1335_v29 = vpop.f32.mrf.mxu0 }
 0x107   :  { %v233_v30 = vpop.f32.mrf.mxu0 }
 0x109   :  { %v1336_v31 = vpop.f32.mrf.mxu0 }
 0x10a   :  { %v297_v34 = vpack.c.bf16 %v1336_v31, %v1335_v29 }
 0x10b   :  { %v236_v32 = vpop.f32.mrf.mxu0 }
 0x10c   :  { %v296_v33 = vpack.c.bf16 %v236_v32, %v233_v30 }
 0x10d   :  { %v1339_v35 = vpop.f32.mrf.mxu0 }
 0x10e   :  { %1365 = vmatprep.mubr.bf16.mxu1 %v296_v33 }
 0x10f   :  { %v249_v36 = vpop.f32.mrf.mxu0  ;;  %1366 = vmatmul.mubr.bf16.vlgmr.msra.gmra.mxu1 %v297_v34 }
 0x111   :  { %v1340_v37 = vpop.f32.mrf.mxu0 }
 0x112   :  { %v299_v40 = vpack.c.bf16 %v1340_v37, %v1339_v35 }
 0x113   :  { %v252_v38 = vpop.f32.mrf.mxu0 }
 0x114   :  { %v298_v39 = vpack.c.bf16 %v252_v38, %v249_v36 }
 0x115   :  { %v1343_v41 = vpop.f32.mrf.mxu0 }
 0x116   :  { %1369 = vmatprep.mubr.bf16.mxu1 %v298_v39 }
 0x117   :  { %v265_v42 = vpop.f32.mrf.mxu0  ;;  %1370 = vmatmul.mubr.bf16.gmra.mxu1 %v299_v40 }
 0x119   :  { %v1344_v43 = vpop.f32.mrf.mxu0 }
 0x11a   :  { %v301_v46 = vpack.c.bf16 %v1344_v43, %v1343_v41 }
 0x11b   :  { %v268_v44 = vpop.f32.mrf.mxu0 }
 0x11c   :  { %v300_v45 = vpack.c.bf16 %v268_v44, %v265_v42 }
 0x11d   :  { %v1347_v47 = vpop.f32.mrf.mxu0 }
 0x11e   :  { %1373 = vmatprep.mubr.bf16.mxu1 %v300_v45 }
 0x11f   :  { %v281_v48 = vpop.f32.mrf.mxu0  ;;  %1374 = vmatmul.mubr.bf16.gmra.mxu1 %v301_v46 }
 0x121   :  { %v1348_v49 = vpop.f32.mrf.mxu0 }
 0x122   :  { %v303_v52 = vpack.c.bf16 %v1348_v49, %v1347_v47 }
 0x123   :  { %v284_v50 = vpop.f32.mrf.mxu0 }
 0x124   :  { %v302_v51 = vpack.c.bf16 %v284_v50, %v281_v48 }
 0x126   :  { %1377 = vmatprep.mubr.bf16.mxu1 %v302_v51 }
 0x127   :  { %1378 = vmatmul.mubr.bf16.gmra.mxu1 %v303_v52 }
 0x128   :  { %1429 = vmatprep.mubr.bf16.mxu1 %v1740_v4 }
 0x1cf   :  { %v1367_v56 = vpop.f32.mrf.mxu1 }
 0x1d0   :  { %v418_v62 = vadd.f32 %v1367_v56, %v1210_v58  ;;  %v1530_v56 = vld [vmem:[#allocation6 + $0x38] sm:$0xff]  }
 0x1d1   :  { %v409_v57 = vpop.f32.mrf.mxu1  ;;  %1445 = vmatprep.subr.bf16.mxu0 %v1530_v56 }
 0x1d2   :  { %v410_v60 = vadd.f32 %v1210_v58, %v409_v57  ;;  %v474_v5 = vmax.f32 %v418_v62, 0.0  ;;  %v1531_v57 = vld [vmem:[#allocation6 + $0x30] sm:$0xff]  }
 0x1d3   :  { %v1368_v59 = vpop.f32.mrf.mxu1 }
 0x1d4   :  { %v421_v61 = vadd.f32 %v1368_v59, %v1210_v58  ;;  %v472_v3 = vmax.f32 %v410_v60, 0.0  ;;  %v1532_v59 = vld [vmem:[#allocation6 + $0x28] sm:$0xff]   ;;  %v1533_v60 = vld [vmem:[#allocation6 + $0x20] sm:$0xff]  }
 0x1d5   :  { %v412_v63 = vpop.f32.mrf.mxu1 }
 0x1d6   :  { %v413_v0 = vadd.f32 %v1210_v58, %v412_v63  ;;  %v475_v1 = vmax.f32 %v421_v61, 0.0 }
 0x1d7   :  { %v1371_v2 = vpop.f32.mrf.mxu1 }
 0x1d8   :  { %v473_v4 = vmax.f32 %v413_v0, 0.0  ;;  %v489_v8 = vpack.c.bf16 %v475_v1, %v474_v5  ;;  %v434_v12 = vadd.f32 %v1371_v2, %v1210_v58 }
 0x1d9   :  { %v425_v6 = vpop.f32.mrf.mxu1 }
 0x1da   :  { %v488_v7 = vpack.c.bf16 %v473_v4, %v472_v3  ;;  %v426_v10 = vadd.f32 %v1210_v58, %v425_v6  ;;  %v478_v26 = vmax.f32 %v434_v12, 0.0 }
 0x1db   :  { %v1372_v9 = vpop.f32.mrf.mxu1 }
 0x1dc   :  { %v437_v11 = vadd.f32 %v1372_v9, %v1210_v58  ;;  %1397 = vmatprep.mubr.bf16.mxu0 %v488_v7  ;;  %v476_v24 = vmax.f32 %v426_v10, 0.0 }
 0x1dd   :  { %v428_v13 = vpop.f32.mrf.mxu1  ;;  %1398 = vmatmul.mubr.bf16.vlgmr.msra.gmra.mxu0 %v489_v8 }
 0x1de   :  { %v429_v16 = vadd.f32 %v1210_v58, %v428_v13  ;;  %v479_v22 = vmax.f32 %v437_v11, 0.0  ;;  %1446 = vmatpush3.bf16.msra.mxu0 %v1530_v56 }
 0x1df   :  { %v1375_v23 = vpop.f32.mrf.mxu1  ;;  %1447 = vmatprep.subr.bf16.mxu0 %v1531_v57 }
 0x1e0   :  { %v477_v25 = vmax.f32 %v429_v16, 0.0  ;;  %v491_v29 = vpack.c.bf16 %v479_v22, %v478_v26  ;;  %v450_v33 = vadd.f32 %v1375_v23, %v1210_v58 }
 0x1e1   :  { %v441_v27 = vpop.f32.mrf.mxu1 }
 0x1e2   :  { %v490_v28 = vpack.c.bf16 %v477_v25, %v476_v24  ;;  %v442_v31 = vadd.f32 %v1210_v58, %v441_v27  ;;  %v482_v40 = vmax.f32 %v450_v33, 0.0  ;;  %1448 = vmatpush3.bf16.msra.mxu0 %v1531_v57 }
 0x1e3   :  { %v1376_v30 = vpop.f32.mrf.mxu1  ;;  %1449 = vmatprep.subr.bf16.mxu0 %v1532_v59 }
 0x1e4   :  { %v453_v32 = vadd.f32 %v1376_v30, %v1210_v58  ;;  %1401 = vmatprep.mubr.bf16.mxu0 %v490_v28  ;;  %v480_v38 = vmax.f32 %v442_v31, 0.0 }
 0x1e5   :  { %v444_v34 = vpop.f32.mrf.mxu1  ;;  %1402 = vmatmul.mubr.bf16.gmra.mxu0 %v491_v29 }
 0x1e6   :  { %v445_v35 = vadd.f32 %v1210_v58, %v444_v34  ;;  %v483_v36 = vmax.f32 %v453_v32, 0.0  ;;  %1450 = vmatpush3.bf16.msra.mxu0 %v1532_v59 }
 0x1e7   :  { %v1379_v37 = vpop.f32.mrf.mxu1  ;;  %1451 = vmatprep.subr.bf16.mxu0 %v1533_v60 }
 0x1e8   :  { %v481_v39 = vmax.f32 %v445_v35, 0.0  ;;  %v493_v43 = vpack.c.bf16 %v483_v36, %v482_v40  ;;  %v466_v47 = vadd.f32 %v1379_v37, %v1210_v58 }
 0x1e9   :  { %v457_v41 = vpop.f32.mrf.mxu1 }
 0x1ea   :  { %v492_v42 = vpack.c.bf16 %v481_v39, %v480_v38  ;;  %v458_v45 = vadd.f32 %v1210_v58, %v457_v41  ;;  %v486_v53 = vmax.f32 %v466_v47, 0.0  ;;  %1452 = vmatpush3.bf16.msra.mxu0 %v1533_v60 }
 0x1eb   :  { %v1380_v44 = vpop.f32.mrf.mxu1 }
 0x1ec   :  { %v469_v46 = vadd.f32 %v1380_v44, %v1210_v58  ;;  %1405 = vmatprep.mubr.bf16.mxu0 %v492_v42  ;;  %v484_v51 = vmax.f32 %v458_v45, 0.0 }
 0x1ed   :  { %v460_v48 = vpop.f32.mrf.mxu1  ;;  %1406 = vmatmul.mubr.bf16.gmra.mxu0 %v493_v43 }
 0x1ee   :  { %v461_v49 = vadd.f32 %v1210_v58, %v460_v48  ;;  %v487_v50 = vmax.f32 %v469_v46, 0.0  ;;  %v1534_v58 = vld [vmem:[#allocation6 + $0x18] sm:$0xff]  }
 0x1ef   :  { %1453 = vmatprep.subr.bf16.mxu0 %v1534_v58 }
 0x1f0   :  { %v485_v52 = vmax.f32 %v461_v49, 0.0  ;;  %v495_v55 = vpack.c.bf16 %v487_v50, %v486_v53  ;;  %1454 = vmatpush3.bf16.msra.mxu0 %v1534_v58 }
 0x1f2   :  { %v494_v54 = vpack.c.bf16 %v485_v52, %v484_v51 }
 0x1f4   :  { %1409 = vmatprep.mubr.bf16.mxu0 %v494_v54 }
 0x1f5   :  { %1410 = vmatmul.mubr.bf16.gmra.mxu0 %v495_v55 }
 0x29d   :  { %v1399_v61 = vpop.f32.mrf.mxu0 }
 0x29f   :  { %v594_v62 = vpop.f32.mrf.mxu0 }
 0x2a1   :  { %v1400_v63 = vpop.f32.mrf.mxu0 }
 0x2a2   :  { %v658_v26 = vpack.c.bf16 %v1400_v63, %v1399_v61 }
 0x2a3   :  { %v597_v0 = vpop.f32.mrf.mxu0 }
 0x2a4   :  { %v657_v27 = vpack.c.bf16 %v597_v0, %v594_v62 }
 0x2a5   :  { %v1403_v1 = vpop.f32.mrf.mxu0 }
 0x2a7   :  { %v610_v2 = vpop.f32.mrf.mxu0 }
 0x2a9   :  { %v1404_v3 = vpop.f32.mrf.mxu0 }
 0x2aa   :  { %v660_v24 = vpack.c.bf16 %v1404_v3, %v1403_v1 }
 0x2ab   :  { %v613_v4 = vpop.f32.mrf.mxu0 }
 0x2ac   :  { %v659_v25 = vpack.c.bf16 %v613_v4, %v610_v2 }
 0x2ad   :  { %v1407_v5 = vpop.f32.mrf.mxu0 }
 0x2af   :  { %v626_v6 = vpop.f32.mrf.mxu0 }
 0x2b1   :  { %v1408_v7 = vpop.f32.mrf.mxu0 }
 0x2b2   :  { %v662_v22 = vpack.c.bf16 %v1408_v7, %v1407_v5 }
 0x2b3   :  { %v629_v8 = vpop.f32.mrf.mxu0 }
 0x2b4   :  { %v661_v23 = vpack.c.bf16 %v629_v8, %v626_v6 }
 0x2b5   :  { %v1411_v9 = vpop.f32.mrf.mxu0 }
 0x2b7   :  { %v642_v10 = vpop.f32.mrf.mxu0 }
 0x2b9   :  { %v1412_v11 = vpop.f32.mrf.mxu0 }
 0x2ba   :  { %v664_v12 = vpack.c.bf16 %v1412_v11, %v1411_v9 }
 0x2bb   :  { %v645_v13 = vpop.f32.mrf.mxu0 }
 0x2bc   :  { %v663_v16 = vpack.c.bf16 %v645_v13, %v642_v10  ;;  %1413 = vmatprep.subr.bf16.mxu1 %v664_v12 }
 0x2bd   :  { %1414 = vmatpush3.bf16.msra.mxu1 %v664_v12 }
 0x2be   :  { %1415 = vmatprep.subr.bf16.mxu1 %v663_v16 }
 0x2c1   :  { %1416 = vmatpush3.bf16.msra.mxu1 %v663_v16 }
 0x2c2   :  { %1417 = vmatprep.subr.bf16.mxu1 %v662_v22 }
 0x2c5   :  { %1418 = vmatpush3.bf16.msra.mxu1 %v662_v22 }
 0x2c6   :  { %1419 = vmatprep.subr.bf16.mxu1 %v661_v23 }
 0x2c9   :  { %1420 = vmatpush3.bf16.msra.mxu1 %v661_v23 }
 0x2ca   :  { %1421 = vmatprep.subr.bf16.mxu1 %v660_v24 }
 0x2cd   :  { %1422 = vmatpush3.bf16.msra.mxu1 %v660_v24  ;;  %v961_v24 = vlaneseq }
 0x2ce   :  { %1423 = vmatprep.subr.bf16.mxu1 %v659_v25 }
 0x2d1   :  { %1424 = vmatpush3.bf16.msra.mxu1 %v659_v25  ;;  %v1811_v25 = vand.u32 127, %v961_v24 }
 0x2d2   :  { %1425 = vmatprep.subr.bf16.mxu1 %v658_v26 }
 0x2d3   :  { %vm963_vm0 = vcmp.lt.s32.totalorder %v1811_v25, 4 }
 0x2d5   :  { %1426 = vmatpush3.bf16.msra.mxu1 %v658_v26  ;;  %v1228_v26 = vld [vmem:[%s2080_s7] ss:$0 sm:$0xff] }
 0x2d6   :  { %1427 = vmatprep.subr.bf16.mxu1 %v657_v27 }
 0x2d9   :  { %1428 = vmatpush3.bf16.msra.mxu1 %v657_v27 }
 0x2da   :  { %1477 = vmatprep.subr.bf16.mxu1 %v1530_v56 }
 0x2dc   :  { %1430 = vmatmul.mubr.bf16.vlgmr.msra.gmra.mxu1 %v1758_v14  ;;  %v1535_v14 = vld [vmem:[#allocation6 + $0x10] sm:$0xff]  }
 0x2dd   :  { %1433 = vmatprep.mubr.bf16.mxu1 %v1763_v15  ;;  %1485 = vmatpush3.bf16.msra.mxu1 %v1530_v56  ;;  %v1536_v15 = vld [vmem:[#allocation6 + $0x8] sm:$0xff]  }
 0x2de   :  { %1478 = vmatprep.subr.bf16.mxu1 %v1531_v57  ;;  %1455 = vmatprep.subr.bf16.mxu0 %v1535_v14 }
 0x2df   :  { %1456 = vmatpush3.bf16.msra.mxu0 %v1535_v14 }
 0x2e0   :  { %1457 = vmatprep.subr.bf16.mxu0 %v1536_v15 }
 0x2e1   :  { %1486 = vmatpush3.bf16.msra.mxu1 %v1531_v57 }
 0x2e2   :  { %1479 = vmatprep.subr.bf16.mxu1 %v1532_v59 }
 0x2e3   :  { %1458 = vmatpush3.bf16.msra.mxu0 %v1536_v15 }
 0x2e4   :  { %1434 = vmatmul.mubr.bf16.gmra.mxu1 %v1770_v17  ;;  %v1537_v17 = vld [vmem:[#allocation6] sm:$0xff]  }
 0x2e5   :  { %1437 = vmatprep.mubr.bf16.mxu1 %v1775_v18  ;;  %1487 = vmatpush3.bf16.msra.mxu1 %v1532_v59 }
 0x2e6   :  { %1480 = vmatprep.subr.bf16.mxu1 %v1533_v60  ;;  %1459 = vmatprep.subr.bf16.mxu0 %v1537_v17 }
 0x2e7   :  { %1460 = vmatpush3.bf16.msra.mxu0 %v1537_v17 }
 0x2e9   :  { %1488 = vmatpush3.bf16.msra.mxu1 %v1533_v60 }
 0x2ea   :  { %1481 = vmatprep.subr.bf16.mxu1 %v1534_v58 }
 0x2ec   :  { %1438 = vmatmul.mubr.bf16.gmra.mxu1 %v1782_v19 }
 0x2ed   :  { %1441 = vmatprep.mubr.bf16.mxu1 %v1787_v20  ;;  %1489 = vmatpush3.bf16.msra.mxu1 %v1534_v58  ;;  %v1227_v20 = vld [vmem:[%s2078_s5] ss:$0 sm:$0xff] }
 0x2ee   :  { %1482 = vmatprep.subr.bf16.mxu1 %v1535_v14 }
 0x2f1   :  { %1490 = vmatpush3.bf16.msra.mxu1 %v1535_v14 }
 0x2f2   :  { %1483 = vmatprep.subr.bf16.mxu1 %v1536_v15 }
 0x2f4   :  { %1442 = vmatmul.mubr.bf16.gmra.mxu1 %v1794_v21 }
 0x2f5   :  { %1491 = vmatpush3.bf16.msra.mxu1 %v1536_v15 }
 0x2f6   :  { %1484 = vmatprep.subr.bf16.mxu1 %v1537_v17 }
 0x2f9   :  { %1492 = vmatpush3.bf16.msra.mxu1 %v1537_v17 }
 0x39c   :  { %v1431_v18 = vpop.f32.mrf.mxu1 }
 0x39d   :  { %v715_v30 = vadd.f32 %v1431_v18, %v1227_v20 }
 0x39e   :  { %v706_v19 = vpop.f32.mrf.mxu1 }
 0x39f   :  { %v707_v28 = vadd.f32 %v1227_v20, %v706_v19  ;;  %v771_v37 = vmax.f32 %v715_v30, 0.0 }
 0x3a0   :  { %v1432_v21 = vpop.f32.mrf.mxu1 }
 0x3a1   :  { %v718_v29 = vadd.f32 %v1432_v21, %v1227_v20  ;;  %v769_v35 = vmax.f32 %v707_v28, 0.0 }
 0x3a2   :  { %v709_v31 = vpop.f32.mrf.mxu1 }
 0x3a3   :  { %v710_v32 = vadd.f32 %v1227_v20, %v709_v31  ;;  %v772_v33 = vmax.f32 %v718_v29, 0.0 }
 0x3a4   :  { %v1435_v34 = vpop.f32.mrf.mxu1 }
 0x3a5   :  { %v770_v36 = vmax.f32 %v710_v32, 0.0  ;;  %v786_v40 = vpack.c.bf16 %v772_v33, %v771_v37  ;;  %v731_v44 = vadd.f32 %v1435_v34, %v1227_v20 }
 0x3a6   :  { %v722_v38 = vpop.f32.mrf.mxu1 }
 0x3a7   :  { %v785_v39 = vpack.c.bf16 %v770_v36, %v769_v35  ;;  %v723_v42 = vadd.f32 %v1227_v20, %v722_v38  ;;  %v775_v51 = vmax.f32 %v731_v44, 0.0 }
 0x3a8   :  { %v1436_v41 = vpop.f32.mrf.mxu1 }
 0x3a9   :  { %v734_v43 = vadd.f32 %v1436_v41, %v1227_v20  ;;  %1461 = vmatprep.mubr.bf16.mxu0 %v785_v39  ;;  %v773_v49 = vmax.f32 %v723_v42, 0.0 }
 0x3aa   :  { %v725_v45 = vpop.f32.mrf.mxu1  ;;  %1462 = vmatmul.mubr.bf16.vlgmr.msra.gmra.mxu0 %v786_v40 }
 0x3ab   :  { %v726_v46 = vadd.f32 %v1227_v20, %v725_v45  ;;  %v776_v47 = vmax.f32 %v734_v43, 0.0 }
 0x3ac   :  { %v1439_v48 = vpop.f32.mrf.mxu1 }
 0x3ad   :  { %v774_v50 = vmax.f32 %v726_v46, 0.0  ;;  %v788_v54 = vpack.c.bf16 %v776_v47, %v775_v51  ;;  %v747_v59 = vadd.f32 %v1439_v48, %v1227_v20 }
 0x3ae   :  { %v738_v52 = vpop.f32.mrf.mxu1 }
 0x3af   :  { %v787_v53 = vpack.c.bf16 %v774_v50, %v773_v49  ;;  %v739_v56 = vadd.f32 %v1227_v20, %v738_v52  ;;  %v779_v1 = vmax.f32 %v747_v59, 0.0 }
 0x3b0   :  { %v1440_v55 = vpop.f32.mrf.mxu1 }
 0x3b1   :  { %v750_v57 = vadd.f32 %v1440_v55, %v1227_v20  ;;  %1465 = vmatprep.mubr.bf16.mxu0 %v787_v53  ;;  %v777_v63 = vmax.f32 %v739_v56, 0.0 }
 0x3b2   :  { %v741_v60 = vpop.f32.mrf.mxu1  ;;  %1466 = vmatmul.mubr.bf16.gmra.mxu0 %v788_v54 }
 0x3b3   :  { %v742_v58 = vadd.f32 %v1227_v20, %v741_v60  ;;  %v780_v61 = vmax.f32 %v750_v57, 0.0 }
 0x3b4   :  { %v1443_v62 = vpop.f32.mrf.mxu1 }
 0x3b5   :  { %v778_v0 = vmax.f32 %v742_v58, 0.0  ;;  %v790_v4 = vpack.c.bf16 %v780_v61, %v779_v1  ;;  %v763_v8 = vadd.f32 %v1443_v62, %v1227_v20 }
 0x3b6   :  { %v754_v2 = vpop.f32.mrf.mxu1 }
 0x3b7   :  { %v789_v3 = vpack.c.bf16 %v778_v0, %v777_v63  ;;  %v755_v6 = vadd.f32 %v1227_v20, %v754_v2  ;;  %v783_v16 = vmax.f32 %v763_v8, 0.0 }
 0x3b8   :  { %v1444_v5 = vpop.f32.mrf.mxu1 }
 0x3b9   :  { %v766_v7 = vadd.f32 %v1444_v5, %v1227_v20  ;;  %1469 = vmatprep.mubr.bf16.mxu1 %v789_v3  ;;  %v781_v12 = vmax.f32 %v755_v6, 0.0 }
 0x3ba   :  { %v757_v9 = vpop.f32.mrf.mxu1  ;;  %1470 = vmatmul.mubr.bf16.vlgmr.msra.gmra.mxu1 %v790_v4 }
 0x3bb   :  { %v758_v10 = vadd.f32 %v1227_v20, %v757_v9  ;;  %v784_v11 = vmax.f32 %v766_v7, 0.0 }
 0x3bd   :  { %v782_v13 = vmax.f32 %v758_v10, 0.0  ;;  %v792_v23 = vpack.c.bf16 %v784_v11, %v783_v16 }
 0x3bf   :  { %v791_v22 = vpack.c.bf16 %v782_v13, %v781_v12 }
 0x3c1   :  { %1473 = vmatprep.mubr.bf16.mxu1 %v791_v22 }
 0x3c2   :  { %1474 = vmatmul.mubr.bf16.gmra.mxu1 %v792_v23 }
 0x46a   :  { %v1463_v27 = vpop.f32.mrf.mxu0 }
 0x46b   :  { %v1817_v14 = vadd.f32 %v1463_v27, %v1228_v26 }
 0x46c   :  { %v898_v15 = vpop.f32.mrf.mxu0 }
 0x46d   :  { %v1819_v17 = vadd.f32 %v1228_v26, %v898_v15  ;;  %v966_v18 = vsel %vm963_vm0, %v1817_v14, -inf }
 0x46e   :  { %984 = vmax.xlane.f32.xlu1 %v966_v18  ;;  %v1464_v19 = vpop.f32.mrf.mxu0 }
 0x46f   :  { %v1824_v20 = vadd.f32 %v1464_v19, %v1228_v26  ;;  %v964_v21 = vsel %vm963_vm0, %v1819_v17, -inf }
 0x470   :  { %v901_v28 = vpop.f32.mrf.mxu0  ;;  %980 = vmax.xlane.f32.xlu0 %v964_v21 }
 0x471   :  { %v1829_v29 = vadd.f32 %v1228_v26, %v901_v28  ;;  %v967_v30 = vsel %vm963_vm0, %v1824_v20, -inf }
 0x472   :  { %986 = vmax.xlane.f32.xlu1 %v967_v30  ;;  %v1467_v31 = vpop.f32.mrf.mxu0 }
 0x473   :  { %v1834_v32 = vadd.f32 %v1467_v31, %v1228_v26  ;;  %v965_v33 = vsel %vm963_vm0, %v1829_v29, -inf }
 0x474   :  { %v914_v34 = vpop.f32.mrf.mxu0  ;;  %982 = vmax.xlane.f32.xlu0 %v965_v33 }
 0x475   :  { %v1839_v36 = vadd.f32 %v1228_v26, %v914_v34  ;;  %v970_v38 = vsel %vm963_vm0, %v1834_v32, -inf }
 0x476   :  { %v1468_v35 = vpop.f32.mrf.mxu0 }
 0x477   :  { %v1841_v37 = vadd.f32 %v1468_v35, %v1228_v26  ;;  %v968_v44 = vsel %vm963_vm0, %v1839_v36, -inf }
 0x478   :  { %v917_v39 = vpop.f32.mrf.mxu0  ;;  %992 = vmax.xlane.f32.xlu0 %v970_v38 }
 0x479   :  { %v1846_v40 = vadd.f32 %v1228_v26, %v917_v39  ;;  %v971_v41 = vsel %vm963_vm0, %v1841_v37, -inf }
 0x47a   :  { %v1471_v42 = vpop.f32.mrf.mxu1  ;;  %994 = vmax.xlane.f32.xlu1 %v971_v41 }
 0x47b   :  { %v1851_v43 = vadd.f32 %v1471_v42, %v1228_v26  ;;  %v969_v46 = vsel %vm963_vm0, %v1846_v40, -inf }
 0x47c   :  { %v930_v45 = vpop.f32.mrf.mxu1  ;;  %988 = vmax.xlane.f32.xlu0 %v968_v44 }
 0x47d   :  { %v1859_v48 = vadd.f32 %v1228_v26, %v930_v45  ;;  %v974_v50 = vsel %vm963_vm0, %v1851_v43, -inf }
 0x47e   :  { %v1472_v47 = vpop.f32.mrf.mxu1  ;;  %990 = vmax.xlane.f32.xlu1 %v969_v46 }
 0x47f   :  { %v1861_v49 = vadd.f32 %v1472_v47, %v1228_v26  ;;  %v972_v55 = vsel %vm963_vm0, %v1859_v48, -inf }
 0x480   :  { %v933_v51 = vpop.f32.mrf.mxu1  ;;  %1000 = vmax.xlane.f32.xlu0 %v974_v50 }
 0x481   :  { %v1866_v52 = vadd.f32 %v1228_v26, %v933_v51  ;;  %v975_v53 = vsel %vm963_vm0, %v1861_v49, -inf }
 0x482   :  { %v1475_v54 = vpop.f32.mrf.mxu1  ;;  %1002 = vmax.xlane.f32.xlu1 %v975_v53 }
 0x483   :  { %v973_v59 = vsel %vm963_vm0, %v1866_v52, -inf  ;;  %v1879_v58 = vadd.f32 %v1475_v54, %v1228_v26 }
 0x484   :  { %v946_v56 = vpop.f32.mrf.mxu1  ;;  %996 = vmax.xlane.f32.xlu0 %v972_v55 }
 0x485   :  { %v1874_v57 = vadd.f32 %v1228_v26, %v946_v56  ;;  %v978_v2 = vsel %vm963_vm0, %v1879_v58, -inf }
 0x486   :  { %v1476_v60 = vpop.f32.mrf.mxu1  ;;  %998 = vmax.xlane.f32.xlu1 %v973_v59 }
 0x487   :  { %v976_v61 = vsel %vm963_vm0, %v1874_v57, -inf  ;;  %v1886_v0 = vadd.f32 %v1476_v60, %v1228_v26 }
 0x488   :  { %v949_v62 = vpop.f32.mrf.mxu1  ;;  %1004 = vmax.xlane.f32.xlu0 %v976_v61 }
 0x489   :  { %v1884_v63 = vadd.f32 %v1228_v26, %v949_v62  ;;  %v979_v3 = vsel %vm963_vm0, %v1886_v0, -inf }
 0x48b   :  { %v977_v1 = vsel %vm963_vm0, %v1884_v63, -inf }
 0x48c   :  { %1006 = vmax.xlane.f32.xlu1 %v977_v1  ;;  %1008 = vmax.xlane.f32.xlu0 %v978_v2 }
 0x490   :  { %1010 = vmax.xlane.f32.xlu1 %v979_v3 }
 0x4f7   :  { %v1897_v4 = vpop.xlane.xlu1 %984 }
 0x4f8   :  { %v1014_v5 = vsub.f32 %v1817_v14, %v1897_v4 }
 0x4f9   :  { %v1901_v6 = vpop.xlane.xlu0 %980 }
 0x4fa   :  { %v1032_v7 = vmul.f32 1.442695, %v1014_v5  ;;  %v1012_v8 = vsub.f32 %v1819_v17, %v1901_v6 }
 0x4fb   :  { %v1905_v9 = vpop.xlane.xlu1 %986 }
 0x4fc   :  { %1538 = vpow2.f32 %v1032_v7  ;;  %v1028_v10 = vmul.f32 1.442695, %v1012_v8  ;;  %v1015_v11 = vsub.f32 %v1824_v20, %v1905_v9 }
 0x4fd   :  { %v1909_v12 = vpop.xlane.xlu0 %982 }
 0x4fe   :  { %1540 = vpow2.f32 %v1028_v10  ;;  %v1034_v13 = vmul.f32 1.442695, %v1015_v11  ;;  %v1013_v16 = vsub.f32 %v1829_v29, %v1909_v12 }
 0x500   :  { %1542 = vpow2.f32 %v1034_v13  ;;  %v1030_v22 = vmul.f32 1.442695, %v1013_v16 }
 0x501   :  { %v1913_v23 = vpop.xlane.xlu0 %992 }
 0x502   :  { %1544 = vpow2.f32 %v1030_v22  ;;  %v1018_v24 = vsub.f32 %v1834_v32, %v1913_v23 }
 0x503   :  { %v1917_v26 = vpop.xlane.xlu1 %994 }
 0x504   :  { %v1040_v27 = vmul.f32 1.442695, %v1018_v24  ;;  %v1019_v15 = vsub.f32 %v1841_v37, %v1917_v26 }
 0x505   :  { %v1921_v18 = vpop.xlane.xlu0 %988 }
 0x506   :  { %1546 = vpow2.f32 %v1040_v27  ;;  %v1042_v19 = vmul.f32 1.442695, %v1019_v15  ;;  %v1016_v21 = vsub.f32 %v1839_v36, %v1921_v18 }
 0x507   :  { %v1925_v28 = vpop.xlane.xlu1 %990 }
 0x508   :  { %1548 = vpow2.f32 %v1042_v19  ;;  %v1036_v30 = vmul.f32 1.442695, %v1016_v21  ;;  %v1017_v31 = vsub.f32 %v1846_v40, %v1925_v28 }
 0x509   :  { %v1539_v33 = vpop.eup %1538  ;;  %v1929_v34 = vpop.xlane.xlu0 %1000 }
 0x50a   :  { %1550 = vpow2.f32 %v1036_v30  ;;  %v1038_v35 = vmul.f32 1.442695, %v1017_v31  ;;  %v1022_v38 = vsub.f32 %v1851_v43, %v1929_v34  ;;  %v1062_v39 = vsel %vm963_vm0, %v1539_v33, 0.0 }
 0x50b   :  { %v1541_v41 = vpop.eup %1540  ;;  %v1935_v42 = vpop.xlane.xlu1 %1002  ;;  %1080 = vadd.xlane.f32.xlu0 %v1062_v39 }
 0x50c   :  { %1552 = vpow2.f32 %v1038_v35  ;;  %v1048_v44 = vmul.f32 1.442695, %v1022_v38  ;;  %v1023_v45 = vsub.f32 %v1861_v49, %v1935_v42  ;;  %v1060_v50 = vsel %vm963_vm0, %v1541_v41, 0.0 }
 0x50d   :  { %v1543_v46 = vpop.eup %1542  ;;  %v1939_v47 = vpop.xlane.xlu0 %996 }
 0x50e   :  { %1554 = vpow2.f32 %v1048_v44  ;;  %v1050_v51 = vmul.f32 1.442695, %v1023_v45  ;;  %v1020_v53 = vsub.f32 %v1859_v48, %v1939_v47  ;;  %v1063_v54 = vsel %vm963_vm0, %v1543_v46, 0.0 }
 0x50f   :  { %v1545_v55 = vpop.eup %1544  ;;  %1082 = vadd.xlane.f32.xlu1 %v1063_v54  ;;  %v1947_v56 = vpop.xlane.xlu1 %998  ;;  %1076 = vadd.xlane.f32.xlu0 %v1060_v50 }
 0x510   :  { %1556 = vpow2.f32 %v1050_v51  ;;  %v1044_v59 = vmul.f32 1.442695, %v1020_v53  ;;  %v1021_v60 = vsub.f32 %v1866_v52, %v1947_v56  ;;  %v1061_v2 = vsel %vm963_vm0, %v1545_v55, 0.0 }
 0x511   :  { %v1951_v61 = vpop.xlane.xlu0 %1004 }
 0x512   :  { %1558 = vpow2.f32 %v1044_v59  ;;  %v1046_v62 = vmul.f32 1.442695, %v1021_v60  ;;  %v1024_v1 = vsub.f32 %v1874_v57, %v1951_v61 }
 0x513   :  { %v1547_v3 = vpop.eup %1546  ;;  %1078 = vadd.xlane.f32.xlu1 %v1061_v2 }
 0x514   :  { %1560 = vpow2.f32 %v1046_v62  ;;  %v1052_v5 = vmul.f32 1.442695, %v1024_v1  ;;  %v1066_v7 = vsel %vm963_vm0, %v1547_v3, 0.0 }
 0x515   :  { %v1549_v8 = vpop.eup %1548  ;;  %v1959_v10 = vpop.xlane.xlu1 %1006  ;;  %1088 = vadd.xlane.f32.xlu0 %v1066_v7 }
 0x516   :  { %v1961_v11 = vpop.xlane.xlu0 %1008  ;;  %1562 = vpow2.f32 %v1052_v5  ;;  %v1025_v13 = vsub.f32 %v1884_v63, %v1959_v10  ;;  %v1067_v22 = vsel %vm963_vm0, %v1549_v8, 0.0 }
 0x517   :  { %v1026_v16 = vsub.f32 %v1879_v58, %v1961_v11  ;;  %v1551_v24 = vpop.eup %1550  ;;  %1090 = vadd.xlane.f32.xlu1 %v1067_v22 }
 0x518   :  { %v1054_v27 = vmul.f32 1.442695, %v1025_v13  ;;  %v1064_v19 = vsel %vm963_vm0, %v1551_v24, 0.0 }
 0x519   :  { %v1056_v15 = vmul.f32 1.442695, %v1026_v16  ;;  %v1553_v21 = vpop.eup %1552  ;;  %v1971_v30 = vpop.xlane.xlu1 %1010  ;;  %1084 = vadd.xlane.f32.xlu0 %v1064_v19 }
 0x51a   :  { %1564 = vpow2.f32 %v1054_v27  ;;  %v1027_v31 = vsub.f32 %v1886_v0, %v1971_v30  ;;  %v1065_v33 = vsel %vm963_vm0, %v1553_v21, 0.0 }
 0x51b   :  { %v1555_v35 = vpop.eup %1554  ;;  %1566 = vpow2.f32 %v1056_v15  ;;  %1086 = vadd.xlane.f32.xlu1 %v1065_v33 }
 0x51c   :  { %v1058_v38 = vmul.f32 1.442695, %v1027_v31  ;;  %v1070_v39 = vsel %vm963_vm0, %v1555_v35, 0.0 }
 0x51d   :  { %v1557_v41 = vpop.eup %1556  ;;  %1096 = vadd.xlane.f32.xlu0 %v1070_v39 }
 0x51e   :  { %1568 = vpow2.f32 %v1058_v38  ;;  %v1071_v44 = vsel %vm963_vm0, %v1557_v41, 0.0 }
 0x51f   :  { %v1559_v45 = vpop.eup %1558  ;;  %1098 = vadd.xlane.f32.xlu1 %v1071_v44 }
 0x520   :  { %v1068_v46 = vsel %vm963_vm0, %v1559_v45, 0.0 }
 0x521   :  { %v1561_v50 = vpop.eup %1560  ;;  %1092 = vadd.xlane.f32.xlu0 %v1068_v46 }
 0x522   :  { %v1069_v51 = vsel %vm963_vm0, %v1561_v50, 0.0 }
 0x523   :  { %v1563_v53 = vpop.eup %1562  ;;  %1094 = vadd.xlane.f32.xlu1 %v1069_v51 }
 0x524   :  { %v1072_v54 = vsel %vm963_vm0, %v1563_v53, 0.0 }
 0x525   :  { %1100 = vadd.xlane.f32.xlu0 %v1072_v54 }
 0x527   :  { %v1565_v55 = vpop.eup %1564 }
 0x528   :  { %v1567_v59 = vpop.eup %1566  ;;  %v1073_v60 = vsel %vm963_vm0, %v1565_v55, 0.0 }
 0x529   :  { %1102 = vadd.xlane.f32.xlu1 %v1073_v60  ;;  %v1074_v62 = vsel %vm963_vm0, %v1567_v59, 0.0 }
 0x52a   :  { %1104 = vadd.xlane.f32.xlu0 %v1074_v62 }
 0x52b   :  { %v1569_v1 = vpop.eup %1568 }
 0x52c   :  { %v1075_v2 = vsel %vm963_vm0, %v1569_v1, 0.0 }
 0x52d   :  { %1106 = vadd.xlane.f32.xlu1 %v1075_v2 }
 0x594   :  { %v1081_v3 = vpop.xlane.xlu0 %1080 }
 0x595   :  { %1570 = vlog2.f32 %v1081_v3 }
 0x598   :  { %v1083_v5 = vpop.xlane.xlu1 %1082  ;;  %v1077_v7 = vpop.xlane.xlu0 %1076 }
 0x599   :  { %1572 = vlog2.f32 %v1083_v5 }
 0x59a   :  { %1574 = vlog2.f32 %v1077_v7 }
 0x59c   :  { %v1079_v8 = vpop.xlane.xlu1 %1078 }
 0x59d   :  { %1576 = vlog2.f32 %v1079_v8 }
 0x59e   :  { %v1089_v13 = vpop.xlane.xlu0 %1088 }
 0x59f   :  { %1578 = vlog2.f32 %v1089_v13 }
 0x5a0   :  { %v1091_v16 = vpop.xlane.xlu1 %1090 }
 0x5a1   :  { %1580 = vlog2.f32 %v1091_v16 }
 0x5a2   :  { %v1571_v22 = vpop.eup %1570  ;;  %v1085_v24 = vpop.xlane.xlu0 %1084 }
 0x5a3   :  { %v1113_v27 = vmul.f32 0.6931472, %v1571_v22  ;;  %1582 = vlog2.f32 %v1085_v24 }
 0x5a4   :  { %v1087_v15 = vpop.xlane.xlu1 %1086 }
 0x5a5   :  { %v1142_v25 = vadd.f32 %v1113_v27, %v1897_v4  ;;  %1584 = vlog2.f32 %v1087_v15 }
 0x5a6   :  { %v1573_v19 = vpop.eup %1572  ;;  %v1097_v21 = vpop.xlane.xlu0 %1096 }
 0x5a7   :  { %v1575_v31 = vpop.eup %1574  ;;  %v1158_v33 = vsub.f32 %v1817_v14, %v1142_v25  ;;  %v1115_v35 = vmul.f32 0.6931472, %v1573_v19  ;;  %1586 = vlog2.f32 %v1097_v21 }
 0x5a8   :  { %v1109_v38 = vmul.f32 0.6931472, %v1575_v31  ;;  %v1099_v39 = vpop.xlane.xlu1 %1098 }
 0x5a9   :  { %1174 = vst [vmem:[%s2081_s8 + $0x10] sm:$0xff] %v1158_v33  ;;  %v1143_v41 = vadd.f32 %v1115_v35, %v1905_v9  ;;  %1588 = vlog2.f32 %v1099_v39 }
 0x5aa   :  { %v1577_v44 = vpop.eup %1576  ;;  %v1140_v4 = vadd.f32 %v1109_v38, %v1901_v6  ;;  %v1093_v45 = vpop.xlane.xlu0 %1092 }
 0x5ab   :  { %v1159_v46 = vsub.f32 %v1824_v20, %v1143_v41  ;;  %v1111_v50 = vmul.f32 0.6931472, %v1577_v44  ;;  %1590 = vlog2.f32 %v1093_v45 }
 0x5ac   :  { %v1579_v14 = vpop.eup %1578  ;;  %v1156_v51 = vsub.f32 %v1819_v17, %v1140_v4  ;;  %v1095_v53 = vpop.xlane.xlu1 %1094 }
 0x5ad   :  { %1175 = vst [vmem:[%s2081_s8 + $0x18] sm:$0xff] %v1159_v46  ;;  %v1141_v54 = vadd.f32 %v1111_v50, %v1909_v12  ;;  %v1121_v9 = vmul.f32 0.6931472, %v1579_v14  ;;  %1592 = vlog2.f32 %v1095_v53 }
 0x5ae   :  { %v1581_v55 = vpop.eup %1580  ;;  %1172 = vst [vmem:[%s2081_s8] sm:$0xff] %v1156_v51  ;;  %v1101_v20 = vpop.xlane.xlu0 %1100 }
 0x5af   :  { %v1157_v6 = vsub.f32 %v1829_v29, %v1141_v54  ;;  %v1146_v59 = vadd.f32 %v1121_v9, %v1913_v23  ;;  %v1123_v17 = vmul.f32 0.6931472, %v1581_v55  ;;  %1594 = vlog2.f32 %v1101_v20 }
 0x5b0   :  { %v1583_v60 = vpop.eup %1582 }
 0x5b1   :  { %1173 = vst [vmem:[%s2081_s8 + $0x8] sm:$0xff] %v1157_v6  ;;  %v1162_v12 = vsub.f32 %v1834_v32, %v1146_v59  ;;  %v1147_v62 = vadd.f32 %v1123_v17, %v1917_v26  ;;  %v1117_v1 = vmul.f32 0.6931472, %v1583_v60 }
 0x5b2   :  { %v1585_v2 = vpop.eup %1584  ;;  %v1103_v3 = vpop.xlane.xlu1 %1102 }
 0x5b3   :  { %1178 = vst [vmem:[%s2081_s8 + $0x30] sm:$0xff] %v1162_v12  ;;  %v1163_v29 = vsub.f32 %v1841_v37, %v1147_v62  ;;  %v1144_v23 = vadd.f32 %v1117_v1, %v1921_v18  ;;  %v1119_v5 = vmul.f32 0.6931472, %v1585_v2  ;;  %1596 = vlog2.f32 %v1103_v3  ;;  %v1105_v7 = vpop.xlane.xlu0 %1104 }
 0x5b4   :  { %v1587_v8 = vpop.eup %1586  ;;  %1598 = vlog2.f32 %v1105_v7 }
 0x5b5   :  { %1179 = vst [vmem:[%s2081_s8 + $0x38] sm:$0xff] %v1163_v29  ;;  %v1160_v32 = vsub.f32 %v1839_v36, %v1144_v23  ;;  %v1145_v26 = vadd.f32 %v1119_v5, %v1925_v28  ;;  %v1129_v13 = vmul.f32 0.6931472, %v1587_v8 }
 0x5b6   :  { %v1589_v16 = vpop.eup %1588  ;;  %v1107_v22 = vpop.xlane.xlu1 %1106 }
 0x5b7   :  { %1176 = vst [vmem:[%s2081_s8 + $0x20] sm:$0xff] %v1160_v32  ;;  %v1161_v37 = vsub.f32 %v1846_v40, %v1145_v26  ;;  %v1150_v18 = vadd.f32 %v1129_v13, %v1929_v34  ;;  %v1131_v24 = vmul.f32 0.6931472, %v1589_v16  ;;  %1600 = vlog2.f32 %v1107_v22 }
 0x5b8   :  { %v1591_v27 = vpop.eup %1590 }
 0x5b9   :  { %1177 = vst [vmem:[%s2081_s8 + $0x28] sm:$0xff] %v1161_v37  ;;  %v1166_v36 = vsub.f32 %v1851_v43, %v1150_v18  ;;  %v1151_v28 = vadd.f32 %v1131_v24, %v1935_v42  ;;  %v1125_v15 = vmul.f32 0.6931472, %v1591_v27 }
 0x5ba   :  { %v1593_v25 = vpop.eup %1592 }
 0x5bb   :  { %1182 = vst [vmem:[%s2081_s8 + $0x50] sm:$0xff] %v1166_v36  ;;  %v1167_v40 = vsub.f32 %v1861_v49, %v1151_v28  ;;  %v1148_v34 = vadd.f32 %v1125_v15, %v1939_v47  ;;  %v1127_v19 = vmul.f32 0.6931472, %v1593_v25 }
 0x5bc   :  { %v1595_v21 = vpop.eup %1594 }
 0x5bd   :  { %1183 = vst [vmem:[%s2081_s8 + $0x58] sm:$0xff] %v1167_v40  ;;  %v1164_v43 = vsub.f32 %v1859_v48, %v1148_v34  ;;  %v1149_v42 = vadd.f32 %v1127_v19, %v1947_v56  ;;  %v1133_v31 = vmul.f32 0.6931472, %v1595_v21 }
 0x5bf   :  { %1180 = vst [vmem:[%s2081_s8 + $0x40] sm:$0xff] %v1164_v43  ;;  %v1165_v33 = vsub.f32 %v1866_v52, %v1149_v42  ;;  %v1152_v49 = vadd.f32 %v1133_v31, %v1951_v61 }
 0x5c0   :  { %v1597_v47 = vpop.eup %1596 }
 0x5c1   :  { %v1599_v35 = vpop.eup %1598  ;;  %1181 = vst [vmem:[%s2081_s8 + $0x48] sm:$0xff] %v1165_v33  ;;  %v1168_v38 = vsub.f32 %v1874_v57, %v1152_v49  ;;  %v1135_v48 = vmul.f32 0.6931472, %v1597_v47 }
 0x5c2   :  { %v1137_v39 = vmul.f32 0.6931472, %v1599_v35 }
 0x5c3   :  { %1184 = vst [vmem:[%s2081_s8 + $0x60] sm:$0xff] %v1168_v38  ;;  %v1153_v56 = vadd.f32 %v1135_v48, %v1959_v10 }
 0x5c4   :  { %v1601_v41 = vpop.eup %1600  ;;  %v1154_v52 = vadd.f32 %v1137_v39, %v1961_v11 }
 0x5c5   :  { %v1169_v61 = vsub.f32 %v1884_v63, %v1153_v56  ;;  %v1139_v44 = vmul.f32 0.6931472, %v1601_v41 }
 0x5c6   :  { %v1170_v4 = vsub.f32 %v1879_v58, %v1154_v52 }
 0x5c7   :  { %1185 = vst [vmem:[%s2081_s8 + $0x68] sm:$0xff] %v1169_v61  ;;  %v1155_v57 = vadd.f32 %v1139_v44, %v1971_v30 }
 0x5c8   :  { %1186 = vst [vmem:[%s2081_s8 + $0x70] sm:$0xff] %v1170_v4 }
 0x5c9   :  { %v1171_v10 = vsub.f32 %v1886_v0, %v1155_v57 }
 0x5cb   :  { %1187 = vst [vmem:[%s2081_s8 + $0x78] sm:$0xff] %v1171_v10 }
 0x5cc   :  { %1192 = vsyncpa [#allocation3], 1 }
 0x5cd   :  { %1193 = vsyncpa [#allocation5], 1 }

</bundles_post_ra>
